<compile_context>
chip_gen: v7x
topology: tpu7x:2x2x1
jax: 0.10.0
libtpu: 0.0.40
codegen_flags: <defaults>
</compile_context>

<pallas_src>
import functools

import jax
import jax.numpy as jnp
from jax.experimental import pallas as pl
from jax.experimental.pallas import tpu as pltpu


def _round_up(x: int, m: int) -> int:
    return ((x + m - 1) // m) * m


def _elementwise_dtype():
    """bf16 bias-add/tanh on chips with bf16 VPU/EUP (v6e, v7x); f32 otherwise."""
    try:
        kind = jax.devices()[0].device_kind.lower()
    except Exception:
        return jnp.float32
    return jnp.bfloat16 if ("v6" in kind or "v7" in kind) else jnp.float32


def _pick_tile_b(batch: int, requested: int) -> int:
    """Pick the batch tile.

    Big tiles amortize the per-grid-step overhead (512 was far below the knee),
    but we (a) never exceed the batch itself -- a block equal to the full array
    dim is always legal, so tiny batches need no padding -- and (b) cap at
    ceil(batch/2) rounded to 128 so there are >= 2 grid steps whenever the batch
    allows, letting v7x's two TensorCores share the 'parallel' batch axis.
    """
    requested = max(128, _round_up(requested, 128))
    if batch <= 128:
        return batch                       # single block == full batch dim
    two_way = _round_up(-(-batch // 2), 128)
    return min(requested, two_way)


def _mlp_policy_kernel(n_layers, obs_ref, *refs):
    """One batch tile of mean_net: [Linear -> tanh] * n_layers -> Linear.

    refs layout: [W0, b0, W1, b1, ..., W_n, b_n, out]
      W_i : (out_i, in_i)   bf16, torch nn.Linear layout, resident in VMEM
      b_i : (out_i, 1)      hidden biases in the elementwise dtype, last bias f32
      obs : (TILE_B, ob_dim) f32, streamed per grid step (native batch-major layout)
      out : (TILE_B, ac_dim) f32

    Rows of a partial final block beyond B hold unspecified data; every op is
    independent per batch row, so they only produce garbage in output rows that
    Pallas drops on the out-of-bounds store.
    """
    n_linear = n_layers + 1
    w_refs = [refs[2 * i] for i in range(n_linear)]
    b_refs = [refs[2 * i + 1] for i in range(n_linear)]
    out_ref = refs[2 * n_linear]

    x = obs_ref[...].astype(jnp.bfloat16)            # (TILE_B, ob_dim), in-kernel cast

    h = x
    mean_cols = None
    for i in range(n_linear):                        # tiny static count -> unrolled
        w = w_refs[i][...]
        if i == 0:
            # (out0, TILE_B) = W0 @ x^T : contract the ob_dim axes (NT matmul),
            # which folds the batch-major -> batch-on-lanes pivot into the MXU.
            acc = jax.lax.dot_general(
                w, x, (((1,), (1,)), ((), ())),
                preferred_element_type=jnp.float32)
        else:
            # (out_i, TILE_B) = W_i @ h : plain MXU matmul, f32 accumulation.
            acc = jnp.dot(w, h, preferred_element_type=jnp.float32)
        if i < n_layers:
            # Hidden layer: bias-add + tanh (build_mlp's default activation).
            # Runs in the bias ref's dtype: bf16 on v6e/v7x, f32 on v5e.
            z = acc.astype(b_refs[i].dtype) + b_refs[i][...]   # (out_i, 1) bcast
            h = jnp.tanh(z).astype(jnp.bfloat16)
        else:
            # Output layer: identity activation, keep f32.
            mean_cols = acc + b_refs[i][...]                   # (ac_dim, TILE_B)

    # Batch-major store: (ac_dim, TILE_B) -> (TILE_B, ac_dim) through the idle
    # XLU, so the wrapper never re-reads/transposes the batch-sized result.
    out_ref[...] = mean_cols.T.astype(out_ref.dtype)


def mlp_policy_forward(obs, weights, biases, logstd, *, tile_b=8192):
    """MLPPolicy.forward (continuous branch) via a batch-tiled Pallas kernel.

    obs:     (B, ob_dim) float32  -- streamed directly, no pre-pass.
    weights: list of (out, in) float32 (torch nn.Linear layout), len n_layers + 1
    biases:  list of (out,) float32, len n_layers + 1
    logstd:  (ac_dim,) float32
    returns: (mean (B, ac_dim) f32, std (ac_dim,) f32) for Normal(mean, std)
    """
    n_layers = len(weights) - 1
    B, ob_dim = obs.shape
    ac_dim = weights[-1].shape[0]

    ew_dtype = _elementwise_dtype()
    tile = _pick_tile_b(B, tile_b)
    num_tiles = pl.cdiv(B, tile)

    # Resident parameters (constant index_map -> DMA'd once, stay in VMEM):
    # bf16 weights, (out, 1) biases broadcasting over the lane (= batch) axis.
    # These casts/reshapes touch only a few KiB of constants; nothing
    # batch-sized runs through XLA outside the kernel.
    flat_params, in_specs = [], []
    in_specs.append(pl.BlockSpec((tile, ob_dim), lambda i: (i, 0)))     # streamed
    for li, (w, b) in enumerate(zip(weights, biases)):
        b_dt = jnp.float32 if li == n_layers else ew_dtype
        w_r = w.astype(jnp.bfloat16)
        b_r = b.reshape(-1, 1).astype(b_dt)
        flat_params += [w_r, b_r]
        in_specs.append(pl.BlockSpec(w_r.shape, lambda i: (0, 0)))      # resident
        in_specs.append(pl.BlockSpec(b_r.shape, lambda i: (0, 0)))      # resident
    # pipeline_mode=pl.Buffered(1) on the resident specs only matters for
    # multi-MiB weights; for this 32-wide net it is noise (per review), so skip.

    dims = [ob_dim] + [w.shape[0] for w in weights]
    flops = 2 * B * sum(dims[i] * dims[i + 1] for i in range(len(dims) - 1))
    transcendentals = B * sum(dims[1:-1])            # one tanh per hidden unit
    bytes_accessed = (B * ob_dim * 4 + B * ac_dim * 4
                      + sum(int(p.size) * p.dtype.itemsize for p in flat_params))

    mean = pl.pallas_call(
        functools.partial(_mlp_policy_kernel, n_layers),
        out_shape=jax.ShapeDtypeStruct((B, ac_dim), jnp.float32),
        grid=(num_tiles,),
        in_specs=in_specs,
        out_specs=pl.BlockSpec((tile, ac_dim), lambda i: (i, 0)),
        compiler_params=pltpu.CompilerParams(
            dimension_semantics=("parallel",)),
        cost_estimate=pl.CostEstimate(
            flops=flops, transcendentals=transcendentals,
            bytes_accessed=bytes_accessed),
    )(obs, *flat_params)

    std = jnp.exp(logstd)     # batch-independent; kept out of the kernel
    return mean, std


def init_params(key, ob_dim, ac_dim, n_layers, layer_size):
    """Deterministic init mimicking nn.Linear's uniform(-1/sqrt(fan_in), 1/sqrt(fan_in)).

    Weights use torch layout (out_dim, in_dim); biases are (out_dim,)."""
    dims = [ob_dim] + [layer_size] * n_layers + [ac_dim]
    weights, biases = [], []
    for i in range(len(dims) - 1):
        fan_in, fan_out = dims[i], dims[i + 1]
        key, kw, kb = jax.random.split(key, 3)
        bound = 1.0 / jnp.sqrt(jnp.float32(fan_in))
        w = jax.random.uniform(kw, (fan_out, fan_in), jnp.float32, -bound, bound)
        b = jax.random.uniform(kb, (fan_out,), jnp.float32, -bound, bound)
        weights.append(w)
        biases.append(b)
    logstd = jnp.zeros((ac_dim,), jnp.float32)   # nn.Parameter(torch.zeros(ac_dim))
    return weights, biases, logstd


if __name__ == "__main__":
    # Shapes consistent with MLPPolicy(ac_dim=8, ob_dim=16, discrete=False,
    # n_layers=2, layer_size=32, ...).  B=384 keeps things small but exercises a
    # 2-step grid (one full 256-row tile + one partial final block).
    B, ob_dim, ac_dim, n_layers, layer_size = 384, 16, 8, 2, 32

    key = jax.random.PRNGKey(0)
    key, k_obs = jax.random.split(key)
    obs = jax.random.normal(k_obs, (B, ob_dim), jnp.float32)
    weights, biases, logstd = init_params(key, ob_dim, ac_dim, n_layers, layer_size)

    mean, std = mlp_policy_forward(obs, weights, biases, logstd)
    mean = jax.block_until_ready(mean)
    std = jax.block_until_ready(std)

    # Reference 1: same cast recipe (bf16 matmul inputs, f32 accumulation, same
    # elementwise dtype) in plain XLA -- tight check.
    ew = _elementwise_dtype()
    h = obs.astype(jnp.bfloat16)
    for i in range(n_layers):
        z = jnp.dot(h, weights[i].T.astype(jnp.bfloat16),
                    preferred_element_type=jnp.float32)
        z = z.astype(ew) + biases[i].astype(ew)
        h = jnp.tanh(z).astype(jnp.bfloat16)
    mean_recipe_ref = (jnp.dot(h, weights[-1].T.astype(jnp.bfloat16),
                               preferred_element_type=jnp.float32) + biases[-1])

    # Reference 2: full-f32 torch-style forward -- loose check on bf16 error.
    h32 = obs
    for i in range(n_layers):
        h32 = jnp.tanh(h32 @ weights[i].T + biases[i])
    mean_f32_ref = h32 @ weights[-1].T + biases[-1]

    assert mean.shape == (B, ac_dim) and mean.dtype == jnp.float32
    assert std.shape == (ac_dim,) and std.dtype == jnp.float32
    tight = 5e-3 if ew == jnp.float32 else 3e-2      # allow for tanh-impl ULP diffs
    assert jnp.allclose(mean, mean_recipe_ref, atol=tight, rtol=tight)
    assert jnp.allclose(mean, mean_f32_ref, atol=5e-2, rtol=5e-2)
    assert jnp.allclose(std, jnp.exp(logstd), atol=1e-6, rtol=1e-6)

    # TODO(synk): Normal.rsample()/Categorical(logits=...) construction and the
    # get_action sampling draw are left to the caller; the kernel returns the
    # distribution parameters (the discrete branch reuses the same MLP for logits).
    print("KERNEL_OK")
</pallas_src>

<mosaic_0001>
module attributes {stable_mosaic.version = 11 : i64} {
  func.func @_mlp_policy_kernel(%arg0: i32, %arg1: memref<256x16xf32, #tpu.memory_space<vmem>>, %arg2: memref<32x16xbf16, #tpu.memory_space<vmem>>, %arg3: memref<32x1xf32, #tpu.memory_space<vmem>>, %arg4: memref<32x32xbf16, #tpu.memory_space<vmem>>, %arg5: memref<32x1xf32, #tpu.memory_space<vmem>>, %arg6: memref<8x32xbf16, #tpu.memory_space<vmem>>, %arg7: memref<8x1xf32, #tpu.memory_space<vmem>>, %arg8: memref<256x8xf32, #tpu.memory_space<vmem>>) attributes {dimension_semantics = [#tpu.dimension_semantics<parallel>], iteration_bounds = array<i64: 2>, scalar_prefetch = 0 : i64, scratch_operands = 0 : i64, tpu.core_type = #tpu.core_type<tc>, window_params = [{transform_indices = @transform_0, window_bounds = array<i64: 256, 16>}, {pipeline_mode = #tpu.pipeline_mode<synchronous>, transform_indices = @transform_1, window_bounds = array<i64: 32, 16>}, {pipeline_mode = #tpu.pipeline_mode<synchronous>, transform_indices = @transform_2, window_bounds = array<i64: 32, 1>}, {pipeline_mode = #tpu.pipeline_mode<synchronous>, transform_indices = @transform_3, window_bounds = array<i64: 32, 32>}, {pipeline_mode = #tpu.pipeline_mode<synchronous>, transform_indices = @transform_4, window_bounds = array<i64: 32, 1>}, {pipeline_mode = #tpu.pipeline_mode<synchronous>, transform_indices = @transform_5, window_bounds = array<i64: 8, 32>}, {pipeline_mode = #tpu.pipeline_mode<synchronous>, transform_indices = @transform_6, window_bounds = array<i64: 8, 1>}, {transform_indices = @transform_7, window_bounds = array<i64: 256, 8>}]} {
    %c0 = arith.constant 0 : index
    %c0_0 = arith.constant 0 : index
    %0 = vector.load %arg1[%c0, %c0_0] : memref<256x16xf32, #tpu.memory_space<vmem>>, vector<256x16xf32>
    %1 = arith.truncf %0 : vector<256x16xf32> to vector<256x16xbf16>
    %c0_1 = arith.constant 0 : index
    %c0_2 = arith.constant 0 : index
    %2 = vector.load %arg2[%c0_1, %c0_2] : memref<32x16xbf16, #tpu.memory_space<vmem>>, vector<32x16xbf16>
    %cst = arith.constant dense<0.000000e+00> : vector<32x256xf32>
    %3 = tpu.matmul %2, %1, %cst {dimension_numbers = #tpu.dot_dimension_numbers<[1], [1], [0], [0], [0, 0, 1, 0], [], []>} : vector<32x16xbf16>, vector<256x16xbf16>, vector<32x256xf32> -> vector<32x256xf32>
    %c0_3 = arith.constant 0 : index
    %c0_4 = arith.constant 0 : index
    %4 = vector.load %arg3[%c0_3, %c0_4] : memref<32x1xf32, #tpu.memory_space<vmem>>, vector<32x1xf32>
    %5 = vector.broadcast %4 : vector<32x1xf32> to vector<32x256xf32>
    %6 = arith.addf %3, %5 : vector<32x256xf32>
    %7 = math.tanh %6 : vector<32x256xf32>
    %8 = arith.truncf %7 : vector<32x256xf32> to vector<32x256xbf16>
    %c0_5 = arith.constant 0 : index
    %c0_6 = arith.constant 0 : index
    %9 = vector.load %arg4[%c0_5, %c0_6] : memref<32x32xbf16, #tpu.memory_space<vmem>>, vector<32x32xbf16>
    %cst_7 = arith.constant dense<0.000000e+00> : vector<32x256xf32>
    %10 = tpu.matmul %9, %8, %cst_7 {dimension_numbers = #tpu.dot_dimension_numbers<[1], [0], [0], [1], [0, 0, 1, 1], [], []>} : vector<32x32xbf16>, vector<32x256xbf16>, vector<32x256xf32> -> vector<32x256xf32>
    %c0_8 = arith.constant 0 : index
    %c0_9 = arith.constant 0 : index
    %11 = vector.load %arg5[%c0_8, %c0_9] : memref<32x1xf32, #tpu.memory_space<vmem>>, vector<32x1xf32>
    %12 = vector.broadcast %11 : vector<32x1xf32> to vector<32x256xf32>
    %13 = arith.addf %10, %12 : vector<32x256xf32>
    %14 = math.tanh %13 : vector<32x256xf32>
    %15 = arith.truncf %14 : vector<32x256xf32> to vector<32x256xbf16>
    %c0_10 = arith.constant 0 : index
    %c0_11 = arith.constant 0 : index
    %16 = vector.load %arg6[%c0_10, %c0_11] : memref<8x32xbf16, #tpu.memory_space<vmem>>, vector<8x32xbf16>
    %cst_12 = arith.constant dense<0.000000e+00> : vector<8x256xf32>
    %17 = tpu.matmul %16, %15, %cst_12 {dimension_numbers = #tpu.dot_dimension_numbers<[1], [0], [0], [1], [0, 0, 1, 1], [], []>} : vector<8x32xbf16>, vector<32x256xbf16>, vector<8x256xf32> -> vector<8x256xf32>
    %c0_13 = arith.constant 0 : index
    %c0_14 = arith.constant 0 : index
    %18 = vector.load %arg7[%c0_13, %c0_14] : memref<8x1xf32, #tpu.memory_space<vmem>>, vector<8x1xf32>
    %19 = vector.broadcast %18 : vector<8x1xf32> to vector<8x256xf32>
    %20 = arith.addf %17, %19 : vector<8x256xf32>
    %21 = tpu.transpose %20, [1, 0] : vector<8x256xf32> -> vector<256x8xf32>
    %c0_15 = arith.constant 0 : index
    %c0_16 = arith.constant 0 : index
    %22 = vector.load %arg8[%c0_15, %c0_16] : memref<256x8xf32, #tpu.memory_space<vmem>>, vector<256x8xf32>
    tpu.vector_store %arg8[%c0_15, %c0_16], %21 {strides = array<i32>} : memref<256x8xf32, #tpu.memory_space<vmem>>, vector<256x8xf32>,
    return
  }
  func.func @transform_0(%arg0: i32) -> (i32, i32) {
    %c0_i32 = arith.constant 0 : i32
    %c0_i32_0 = arith.constant 0 : i32
    return %arg0, %c0_i32 : i32, i32
  }
  func.func @transform_1(%arg0: i32) -> (i32, i32) {
    %c0_i32 = arith.constant 0 : i32
    %c0_i32_0 = arith.constant 0 : i32
    %c0_i32_1 = arith.constant 0 : i32
    return %c0_i32, %c0_i32_0 : i32, i32
  }
  func.func @transform_2(%arg0: i32) -> (i32, i32) {
    %c0_i32 = arith.constant 0 : i32
    %c0_i32_0 = arith.constant 0 : i32
    %c0_i32_1 = arith.constant 0 : i32
    return %c0_i32, %c0_i32_0 : i32, i32
  }
  func.func @transform_3(%arg0: i32) -> (i32, i32) {
    %c0_i32 = arith.constant 0 : i32
    %c0_i32_0 = arith.constant 0 : i32
    %c0_i32_1 = arith.constant 0 : i32
    return %c0_i32, %c0_i32_0 : i32, i32
  }
  func.func @transform_4(%arg0: i32) -> (i32, i32) {
    %c0_i32 = arith.constant 0 : i32
    %c0_i32_0 = arith.constant 0 : i32
    %c0_i32_1 = arith.constant 0 : i32
    return %c0_i32, %c0_i32_0 : i32, i32
  }
  func.func @transform_5(%arg0: i32) -> (i32, i32) {
    %c0_i32 = arith.constant 0 : i32
    %c0_i32_0 = arith.constant 0 : i32
    %c0_i32_1 = arith.constant 0 : i32
    return %c0_i32, %c0_i32_0 : i32, i32
  }
  func.func @transform_6(%arg0: i32) -> (i32, i32) {
    %c0_i32 = arith.constant 0 : i32
    %c0_i32_0 = arith.constant 0 : i32
    %c0_i32_1 = arith.constant 0 : i32
    return %c0_i32, %c0_i32_0 : i32, i32
  }
  func.func @transform_7(%arg0: i32) -> (i32, i32) {
    %c0_i32 = arith.constant 0 : i32
    %c0_i32_0 = arith.constant 0 : i32
    return %arg0, %c0_i32 : i32, i32
  }
}

</mosaic_0001>

<bundles_post_ra>
// kernel: tpu_custom_call.1
= control target key start
LH: loop header
LB: loop body
LE: loop exit
PB: predicated region body
PF: predicated region fallthrough
CT: control target
= control target key end

     0   :  { %s1425_s24 = smov 0   ;;  %s1427_s25 = smov 0   ;;  %s1776_s0 = inlined_call_operand.vmem [shape: f32[384,16], index: 0, kind: input, shape index: {}]   ;;  %s1777_s1 = inlined_call_operand.vmem [shape: bf16[32,16], index: 1, kind: input, shape index: {}]   ;;  %s1778_s2 = inlined_call_operand.vmem [shape: f32[32,1], index: 2, kind: input, shape index: {}]   ;;  %s1779_s3 = inlined_call_operand.vmem [shape: bf16[32,32], index: 3, kind: input, shape index: {}]   ;;  %s1780_s4 = inlined_call_operand.vmem [shape: f32[32,1], index: 4, kind: input, shape index: {}]   ;;  %s1781_s5 = inlined_call_operand.vmem [shape: bf16[8,32], index: 5, kind: input, shape index: {}]   ;;  %s1782_s6 = inlined_call_operand.vmem [shape: f32[8,1], index: 6, kind: input, shape index: {}]   ;;  %s1783_s7 = inlined_call_operand.vmem [shape: f32[384,8], index: 7, kind: output, shape index: {}]  }
   0x1   :  { %s1429_s26 = smov 0  }
   0x2 LB: > { %s1438_s27 = sadd.s32 4294967295, %s1350_s26   ;;  %s1440_s28 = sadd.s32 1, %s1350_s26   ;;  %s1350_s26 = sphi %s1429_s26, %s1792_s26   ;;  %s1346_s25 = sphi %s1427_s25, %s1791_s25   ;;  %s1342_s24 = sphi %s1425_s24, %s1790_s24  }
   0x3   : > { %s173_s29 = ssub.s32 %s1350_s26, %s1440_s28  ;;  %s176_s30 = sadd.s32 1, %s1346_s25 }
   0x4   : > { %p174_p0 = scmp.eq.s32.totalorder %s173_s29, 0  ;;  %p186_p1 = scmp.ne.s32.totalorder %s1346_s25, %s1342_s24 }
   0x5   : > { %p187_p2 = scmp.eq.s32.totalorder %s1438_s27, 1  ;;  %p1107_p3 = scmp.ge.s32.totalorder %s1350_s26, 1 }
   0x6   : > { %s1448_s8 = scalar_select %p174_p0, %s1346_s25, %s176_s30  }
   0x7   : > { %p1450_p4 = por %p187_p2, %p186_p1  ;;  %p246_p5 = scmp.lt.s32.totalorder %s1350_s26, 3 }
   0x9   : > { %p247_p6 = pnand %p1107_p3, %p246_p5 }
   0xa   : > { %s1455_s10 = sshll.u32 (!%p247_p6), %s1438_s27, 5  ;;  %v1461_v0 = vld [vmem:[%s1777_s1] sm:$0xff] (!%p247_p6)   ;;  %vm387_vm0 = vcmask (!%p247_p6), 130048   ;;  %v1384_v2 = vmov (!%p247_p6), 0   ;;  %v355_v3 = vld [vmem:[%s1778_s2 + $0x10] sm:$0xff] (!%p247_p6)  ;;  %v354_v4 = vld [vmem:[%s1778_s2 + $0x8] sm:$0xff] (!%p247_p6) }
   0xb   : > { %250 = sbr.rel (%p247_p6) target bundleno = 1035 (0x40b), region = 48  ;;  %p286_p7 = scmp.lt.s32.totalorder (!%p247_p6), %s1455_s10, 47  ;;  %v353_v1 = vld [vmem:[%s1778_s2] sm:$0xff] (!%p247_p6)  ;;  %1156 = vmatprep.mubr.msk.bf16.mxu0 (!%p247_p6), %vm387_vm0, %v1461_v0  ;;  %1258 = vset.pattern.permute.xlu0 (!%p247_p6), %v1384_v2  ;;  %v356_v5 = vld [vmem:[%s1778_s2 + $0x18] sm:$0xff] (!%p247_p6)  ;;  %v512_v18 = vld [vmem:[%s1780_s4 + $0x8] sm:$0xff] (!%p247_p6)  ;;  %vm545_vm1 = vcmask (!%p247_p6), 261120  }
   0xc   : > { %359 = vperm.xlu0 (!%p247_p6), %1258, %v353_v1   ;;  %1259 = vset.pattern.permute.xlu1 (!%p247_p6), %v1384_v2  ;;  %v511_v15 = vld [vmem:[%s1780_s4] sm:$0xff] (!%p247_p6)  ;;  %v513_v21 = vld [vmem:[%s1780_s4 + $0x10] sm:$0xff] (!%p247_p6)  ;;  %v514_v24 = vld [vmem:[%s1780_s4 + $0x18] sm:$0xff] (!%p247_p6)  ;;  %s278_s12 = sand.u32 (!%p247_p6), 1, %s1342_s24   ;;  %vm732_vm2 = vcmask (!%p247_p6), 64512  }
   0xd   : > { %369 = vperm.xlu1 (!%p247_p6), %1259, %v355_v3   ;;  %584 = vmatprep.mubr.bf16.mxu1 (!%p247_p6), %v1384_v2  ;;  %v618_v27 = vld [vmem:[%s1782_s6] sm:$0xff] (!%p247_p6)  ;;  %s1108_s13 = sshll.u32 (!%p247_p6), %s278_s12, 8 }
   0xe   : > { %s1571_s14 = scalar_lea.vmem (!%p247_p6), [#allocation2], %s1108_s13  }
  0x10   : > { %364 = vperm.xlu0 (!%p247_p6), %1258, %v354_v4  }
  0x11   : > { %374 = vperm.xlu1 (!%p247_p6), %1259, %v356_v5   ;;  %v1261_v5 = vld [vmem:[%s1777_s1 + $0x8] sm:$0xff] (!%p247_p6)  }
  0x12   : > { %s287_s15 = scalar_select %p286_p7, %s1455_s10, 47 }
  0x13   : > { %s773_s24 = ssub.s32 (%p1450_p4), 48, %s1455_s10 }
  0x14   : > { %s1110_s18 = sshll.u32 %s287_s15, 3  ;;  %517 = vperm.xlu0 %1258, %v511_v15   ;;  %s1137_s15 = sshll.u32 (%p1450_p4), %s1438_s27, 8 }
  0x15   : > { %s1481_s23 = scalar_lea.vmem %s1776_s0, %s1110_s18  ;;  %522 = vperm.xlu1 %1259, %v512_v18   ;;  %p774_p8 = scmp.lt.s32.totalorder (%p1450_p4), %s773_s24, 32 }
  0x16   : > { %v317_v6 = vld [vmem:[%s1481_s23 + $0x80] sm:$0xff]  ;;  %v318_v7 = vld [vmem:[%s1481_s23 + $0x88] sm:$0xff]  ;;  %v319_v11 = vld [vmem:[%s1481_s23 + $0x90] sm:$0xff]  ;;  %s1644_s18 = scalar_lea.vmem (%p1450_p4), %s1783_s7, %s1137_s15  }
  0x17   : > { %v301_v8 = vld [vmem:[%s1481_s23] sm:$0xff]  ;;  %v341_v9 = vpack.c.bf16 %v318_v7, %v317_v6  ;;  %v302_v10 = vld [vmem:[%s1481_s23 + $0x8] sm:$0xff]  ;;  %v320_v12 = vld [vmem:[%s1481_s23 + $0x98] sm:$0xff] }
  0x18   : > { %v333_v13 = vpack.c.bf16 %v302_v10, %v301_v8  ;;  %v342_v14 = vpack.c.bf16 %v320_v12, %v319_v11  ;;  %v303_v16 = vld [vmem:[%s1481_s23 + $0x10] sm:$0xff]  ;;  %v304_v17 = vld [vmem:[%s1481_s23 + $0x18] sm:$0xff]  ;;  %v321_v22 = vld [vmem:[%s1481_s23 + $0xa0] sm:$0xff]  ;;  %527 = vperm.xlu0 %1258, %v513_v21  }
  0x19   : > { %1160 = vmatprep.subr.msk.bf16.mxu0 %vm387_vm0, %v341_v9  ;;  %v334_v20 = vpack.c.bf16 %v304_v17, %v303_v16  ;;  %v322_v23 = vld [vmem:[%s1481_s23 + $0xa8] sm:$0xff]  ;;  %532 = vperm.xlu1 %1259, %v514_v24   ;;  %v305_v28 = vld [vmem:[%s1481_s23 + $0x20] sm:$0xff]  ;;  %v323_v31 = vld [vmem:[%s1481_s23 + $0xb0] sm:$0xff] }
  0x1a   : > { %v395_v19 = vsel %vm387_vm0, %v333_v13, 0  ;;  %v343_v26 = vpack.c.bf16 %v322_v23, %v321_v22  ;;  %v306_v29 = vld [vmem:[%s1481_s23 + $0x28] sm:$0xff]  ;;  %v324_v32 = vld [vmem:[%s1481_s23 + $0xb8] sm:$0xff]  ;;  %v307_v35 = vld [vmem:[%s1481_s23 + $0x30] sm:$0xff] }
  0x1b   : > { %1141 = vmatpush3.bf16.xpose.msra.mxu0 %v395_v19  ;;  %v398_v25 = vsel %vm387_vm0, %v334_v20, 0  ;;  %v335_v30 = vpack.c.bf16 %v306_v29, %v305_v28  ;;  %v344_v34 = vpack.c.bf16 %v324_v32, %v323_v31  ;;  %v308_v36 = vld [vmem:[%s1481_s23 + $0x38] sm:$0xff]  ;;  %v325_v38 = vld [vmem:[%s1481_s23 + $0xc0] sm:$0xff]  ;;  %v326_v39 = vld [vmem:[%s1481_s23 + $0xc8] sm:$0xff] }
  0x1c   : > { %1161 = vmatprep.subr.msk.bf16.mxu0 %vm387_vm0, %v342_v14  ;;  %621 = vperm.xlu0 %1258, %v618_v27   ;;  %v336_v37 = vpack.c.bf16 %v308_v36, %v307_v35  ;;  %v345_v41 = vpack.c.bf16 %v326_v39, %v325_v38  ;;  %v309_v42 = vld [vmem:[%s1481_s23 + $0x40] sm:$0xff]  ;;  %v310_v43 = vld [vmem:[%s1481_s23 + $0x48] sm:$0xff]  ;;  %v327_v45 = vld [vmem:[%s1481_s23 + $0xd0] sm:$0xff] }
  0x1d   : > { %v401_v33 = vsel %vm387_vm0, %v335_v30, 0  ;;  %v337_v44 = vpack.c.bf16 %v310_v43, %v309_v42  ;;  %v328_v46 = vld [vmem:[%s1481_s23 + $0xd8] sm:$0xff]  ;;  %v311_v49 = vld [vmem:[%s1481_s23 + $0x50] sm:$0xff]  ;;  %v329_v52 = vld [vmem:[%s1481_s23 + $0xe0] sm:$0xff] }
  0x1e   : > { %v404_v40 = vsel %vm387_vm0, %v336_v37, 0  ;;  %v346_v48 = vpack.c.bf16 %v328_v46, %v327_v45  ;;  %v312_v50 = vld [vmem:[%s1481_s23 + $0x58] sm:$0xff]  ;;  %v330_v53 = vld [vmem:[%s1481_s23 + $0xe8] sm:$0xff]  ;;  %v313_v56 = vld [vmem:[%s1481_s23 + $0x60] sm:$0xff] }
  0x1f   : > { %v407_v47 = vsel %vm387_vm0, %v337_v44, 0  ;;  %v338_v51 = vpack.c.bf16 %v312_v50, %v311_v49  ;;  %v347_v55 = vpack.c.bf16 %v330_v53, %v329_v52  ;;  %v314_v57 = vld [vmem:[%s1481_s23 + $0x68] sm:$0xff]  ;;  %v331_v59 = vld [vmem:[%s1481_s23 + $0xf0] sm:$0xff]  ;;  %v332_v60 = vld [vmem:[%s1481_s23 + $0xf8] sm:$0xff] }
  0x20   : > { %v339_v58 = vpack.c.bf16 %v314_v57, %v313_v56  ;;  %v348_v62 = vpack.c.bf16 %v332_v60, %v331_v59  ;;  %v315_v63 = vld [vmem:[%s1481_s23 + $0x70] sm:$0xff]  ;;  %v316_v1 = vld [vmem:[%s1481_s23 + $0x78] sm:$0xff]  ;;  %v1262_v37 = vld [vmem:[%s1779_s3] sm:$0xff]  }
  0x21   : > { %v410_v54 = vsel %vm387_vm0, %v338_v51, 0  ;;  %v340_v3 = vpack.c.bf16 %v316_v1, %v315_v63  ;;  %v1263_v38 = vld [vmem:[%s1779_s3 + $0x8] sm:$0xff]  }
  0x22   : > { %v413_v61 = vsel %vm387_vm0, %v339_v58, 0 }
  0x23   : > { %1143 = vmatpush3.bf16.xpose.msra.mxu0 %v398_v25  ;;  %v416_v4 = vsel %vm387_vm0, %v340_v3, 0 }
  0x24   : > { %1162 = vmatprep.subr.msk.bf16.mxu0 %vm387_vm0, %v343_v26 }
  0x2b   : > { %1145 = vmatpush3.bf16.xpose.msra.mxu0 %v401_v33 }
  0x2c   : > { %1163 = vmatprep.subr.msk.bf16.mxu0 %vm387_vm0, %v344_v34 }
  0x33   : > { %1147 = vmatpush3.bf16.xpose.msra.mxu0 %v404_v40 }
  0x34   : > { %1164 = vmatprep.subr.msk.bf16.mxu0 %vm387_vm0, %v345_v41 }
  0x3b   : > { %1149 = vmatpush3.bf16.xpose.msra.mxu0 %v407_v47 }
  0x3c   : > { %1165 = vmatprep.subr.msk.bf16.mxu0 %vm387_vm0, %v346_v48 }
  0x43   : > { %1151 = vmatpush3.bf16.xpose.msra.mxu0 %v410_v54 }
  0x44   : > { %1166 = vmatprep.subr.msk.bf16.mxu0 %vm387_vm0, %v347_v55 }
  0x4b   : > { %1153 = vmatpush3.bf16.xpose.msra.mxu0 %v413_v61 }
  0x4c   : > { %1167 = vmatprep.subr.msk.bf16.mxu0 %vm387_vm0, %v348_v62 }
  0x53   : > { %1155 = vmatpush3.bf16.xpose.msra.mxu0 %v416_v4 }
  0x5a   : > { %1157 = vmatmul.mubr.msk.bf16.vlgmr.msra.gmra.mrb[0].mxu0 %vm387_vm0, %v1461_v0 }
  0x5b   : > { %1158 = vmatprep.mubr.msk.bf16.mxu0 %vm387_vm0, %v1261_v5 }
  0x62   : > { %1159 = vmatmul.mubr.msk.bf16.gmra.mrb[4].mxu0 %vm387_vm0, %v1261_v5 }
  0x8b   : > { %v360_v6 = vpop.permute.xlu0 %359 }
  0x8c   : > { %v370_v15 = vpop.permute.xlu1 %369 }
  0x8f   : > { %v365_v10 = vpop.permute.xlu0 %364 }
  0x90   : > { %v375_v19 = vpop.permute.xlu1 %374 }
  0x93   : > { %v518_v39 = vpop.permute.xlu0 %517 }
  0x94   : > { %v523_v43 = vpop.permute.xlu1 %522 }
  0x97   : > { %v528_v49 = vpop.permute.xlu0 %527 }
  0x98   : > { %v533_v53 = vpop.permute.xlu1 %532 }
 0x12d   : > { %v476_v7 = vpop.f32.mrb[0].mxu0 }
 0x12e   : > { %v477_v8 = vadd.f32 %v476_v7, %v360_v6  ;;  %v478_v9 = vpop.f32.mrb[1].mxu0 }
 0x12f   : > { %v479_v11 = vadd.f32 %v478_v9, %v360_v6  ;;  %v480_v12 = vpop.f32.mrb[2].mxu0  ;;  %v622_v9 = vpop.permute.xlu0 %621 }
 0x130   : > { %1264 = vtanh.f32 %v477_v8  ;;  %v481_v13 = vadd.f32 %v480_v12, %v365_v10  ;;  %v482_v14 = vpop.f32.mrb[3].mxu0  ;;  %v617_v8 = vld [vmem:[%s1781_s5] sm:$0xf] }
 0x131   : > { %1266 = vtanh.f32 %v479_v11  ;;  %v483_v16 = vadd.f32 %v482_v14, %v365_v10 }
 0x132   : > { %1268 = vtanh.f32 %v481_v13 }
 0x133   : > { %1270 = vtanh.f32 %v483_v16 }
 0x135   : > { %v486_v0 = vpop.f32.mrb[4].mxu0 }
 0x136   : > { %v487_v17 = vadd.f32 %v486_v0, %v370_v15  ;;  %v488_v18 = vpop.f32.mrb[5].mxu0 }
 0x137   : > { %v489_v20 = vadd.f32 %v488_v18, %v370_v15  ;;  %v490_v21 = vpop.f32.mrb[6].mxu0 }
 0x138   : > { %1272 = vtanh.f32 %v487_v17  ;;  %v491_v22 = vadd.f32 %v490_v21, %v375_v19  ;;  %v492_v23 = vpop.f32.mrb[7].mxu0 }
 0x139   : > { %1274 = vtanh.f32 %v489_v20  ;;  %v493_v24 = vadd.f32 %v492_v23, %v375_v19 }
 0x13a   : > { %v1265_v25 = vpop.eup %1264  ;;  %1276 = vtanh.f32 %v491_v22 }
 0x13b   : > { %v1267_v26 = vpop.eup %1266  ;;  %1278 = vtanh.f32 %v493_v24 }
 0x13c   : > { %v1269_v27 = vpop.eup %1268 }
 0x13d   : > { %v1271_v28 = vpop.eup %1270  ;;  %v503_v29 = vpack.c.bf16 %v1269_v27, %v1265_v25 }
 0x13e   : > { %v504_v30 = vpack.c.bf16 %v1271_v28, %v1267_v26 }
 0x140   : > { %552 = vmatprep.subr.bf16.mxu1 %v504_v30 }
 0x141   : > { %553 = vmatpush1.bf16.msra.mxu1 %v503_v29 }
 0x142   : > { %v1273_v31 = vpop.eup %1272 }
 0x143   : > { %v1275_v32 = vpop.eup %1274 }
 0x144   : > { %v1277_v33 = vpop.eup %1276 }
 0x145   : > { %v1279_v34 = vpop.eup %1278  ;;  %v505_v35 = vpack.c.bf16 %v1277_v33, %v1273_v31 }
 0x146   : > { %v506_v36 = vpack.c.bf16 %v1279_v34, %v1275_v32 }
 0x148   : > { %554 = vmatprep.subr.bf16.mxu1 %v506_v36 }
 0x149   : > { %555 = vmatpush1.bf16.msra.mxu1 %v505_v35 }
 0x14c   : > { %1117 = vmatmul.mubr.msk.bf16.vlgmr.msra.gmra.mrb[0].mxu1 %vm545_vm1, %v1262_v37 }
 0x14d   : > { %594 = vmatprep.mubr.bf16.mxu1 %v1384_v2 }
 0x154   : > { %1118 = vmatmul.mubr.msk.bf16.gmra.mrb[4].mxu1 %vm545_vm1, %v1263_v38 }
 0x155   : > { %659 = vmatprep.mubr.bf16.mxu1 %v1384_v2 }
 0x21f   : > { %v586_v40 = vpop.f32.mrb[0].mxu1 }
 0x220   : > { %v587_v41 = vadd.f32 %v586_v40, %v518_v39  ;;  %v588_v42 = vpop.f32.mrb[1].mxu1 }
 0x221   : > { %v589_v44 = vadd.f32 %v588_v42, %v518_v39  ;;  %v590_v45 = vpop.f32.mrb[2].mxu1 }
 0x222   : > { %1280 = vtanh.f32 %v587_v41  ;;  %v591_v46 = vadd.f32 %v590_v45, %v523_v43  ;;  %v592_v47 = vpop.f32.mrb[3].mxu1 }
 0x223   : > { %1282 = vtanh.f32 %v589_v44  ;;  %v593_v48 = vadd.f32 %v592_v47, %v523_v43 }
 0x224   : > { %1284 = vtanh.f32 %v591_v46 }
 0x225   : > { %1286 = vtanh.f32 %v593_v48 }
 0x227   : > { %v596_v50 = vpop.f32.mrb[4].mxu1 }
 0x228   : > { %v597_v51 = vadd.f32 %v596_v50, %v528_v49  ;;  %v598_v52 = vpop.f32.mrb[5].mxu1 }
 0x229   : > { %v599_v2 = vadd.f32 %v598_v52, %v528_v49  ;;  %v600_v54 = vpop.f32.mrb[6].mxu1 }
 0x22a   : > { %1288 = vtanh.f32 %v597_v51  ;;  %v601_v55 = vadd.f32 %v600_v54, %v533_v53  ;;  %v602_v56 = vpop.f32.mrb[7].mxu1 }
 0x22b   : > { %1290 = vtanh.f32 %v599_v2  ;;  %v603_v57 = vadd.f32 %v602_v56, %v533_v53 }
 0x22c   : > { %v1281_v58 = vpop.eup %1280  ;;  %1292 = vtanh.f32 %v601_v55 }
 0x22d   : > { %v1283_v59 = vpop.eup %1282  ;;  %1294 = vtanh.f32 %v603_v57 }
 0x22e   : > { %v1285_v60 = vpop.eup %1284 }
 0x22f   : > { %v1287_v61 = vpop.eup %1286  ;;  %v613_v62 = vpack.c.bf16 %v1285_v60, %v1281_v58 }
 0x230   : > { %v614_v63 = vpack.c.bf16 %v1287_v61, %v1283_v59 }
 0x232   : > { %627 = vmatprep.subr.bf16.mxu1 %v614_v63 }
 0x233   : > { %628 = vmatpush1.bf16.msra.mxu1 %v613_v62 }
 0x234   : > { %v1289_v1 = vpop.eup %1288 }
 0x235   : > { %v1291_v3 = vpop.eup %1290 }
 0x236   : > { %v1293_v4 = vpop.eup %1292 }
 0x237   : > { %v1295_v5 = vpop.eup %1294  ;;  %v615_v6 = vpack.c.bf16 %v1293_v4, %v1289_v1 }
 0x238   : > { %v616_v7 = vpack.c.bf16 %v1295_v5, %v1291_v3 }
 0x23a   : > { %629 = vmatprep.subr.bf16.mxu1 %v616_v7 }
 0x23b   : > { %630 = vmatpush1.bf16.msra.mxu1 %v615_v6 }
 0x23e   : > { %1119 = vmatmul.mubr.msk.bf16.vlgmr.msra.gmra.mrb[8].mxu1 %vm545_vm1, %v617_v8 }
 0x311   : > { %v661_v10 = vpop.f32.mrb[8].mxu1 }
 0x312   : > { %v662_v11 = vadd.f32 %v661_v10, %v622_v9  ;;  %v663_v12 = vpop.f32.mrb[9].mxu1 }
 0x313   : > { %v664_v13 = vadd.f32 %v663_v12, %v622_v9  ;;  %v665_v14 = vpop.f32.mrb[10].mxu1 }
 0x314   : > { %668 = vxpose.xlu1.b32.start.end [1/1] (short) %v662_v11, 128  ;;  %v666_v15 = vpop.f32.mrb[11].mxu1 }
 0x315   : > { %700 = vxpose.xlu0.b32.start.end [1/1] (short) %v664_v13, 128 }
 0x394   : > { %v684_v16 = vpop.trf.xlu1 }
 0x395   : > { %v716_v0 = vpop.trf.xlu0  ;;  %733 = vst.msk [vmem:[%s1571_s14] sm:$0xff] %vm732_vm2, %v684_v16 }
 0x396   : > { %749 = vst.msk [vmem:[%s1571_s14 + $0x80] sm:$0xff] %vm732_vm2, %v716_v0 }
 0x398   : > { %v685_v17 = vpop.trf.xlu1 }
 0x399   : > { %v717_v18 = vpop.trf.xlu0  ;;  %734 = vst.msk [vmem:[%s1571_s14 + $0x8] sm:$0xff] %vm732_vm2, %v685_v17 }
 0x39a   : > { %750 = vst.msk [vmem:[%s1571_s14 + $0x88] sm:$0xff] %vm732_vm2, %v717_v18 }
 0x39c   : > { %v686_v19 = vpop.trf.xlu1 }
 0x39d   : > { %v718_v20 = vpop.trf.xlu0  ;;  %735 = vst.msk [vmem:[%s1571_s14 + $0x10] sm:$0xff] %vm732_vm2, %v686_v19 }
 0x39e   : > { %751 = vst.msk [vmem:[%s1571_s14 + $0x90] sm:$0xff] %vm732_vm2, %v718_v20 }
 0x3a0   : > { %v687_v21 = vpop.trf.xlu1 }
 0x3a1   : > { %v719_v22 = vpop.trf.xlu0  ;;  %736 = vst.msk [vmem:[%s1571_s14 + $0x18] sm:$0xff] %vm732_vm2, %v687_v21 }
 0x3a2   : > { %752 = vst.msk [vmem:[%s1571_s14 + $0x98] sm:$0xff] %vm732_vm2, %v719_v22 }
 0x3a4   : > { %v688_v23 = vpop.trf.xlu1 }
 0x3a5   : > { %v720_v24 = vpop.trf.xlu0  ;;  %737 = vst.msk [vmem:[%s1571_s14 + $0x20] sm:$0xff] %vm732_vm2, %v688_v23 }
 0x3a6   : > { %753 = vst.msk [vmem:[%s1571_s14 + $0xa0] sm:$0xff] %vm732_vm2, %v720_v24 }
 0x3a8   : > { %v689_v25 = vpop.trf.xlu1 }
 0x3a9   : > { %v721_v26 = vpop.trf.xlu0  ;;  %738 = vst.msk [vmem:[%s1571_s14 + $0x28] sm:$0xff] %vm732_vm2, %v689_v25 }
 0x3aa   : > { %754 = vst.msk [vmem:[%s1571_s14 + $0xa8] sm:$0xff] %vm732_vm2, %v721_v26 }
 0x3ac   : > { %v690_v27 = vpop.trf.xlu1 }
 0x3ad   : > { %v722_v28 = vpop.trf.xlu0  ;;  %739 = vst.msk [vmem:[%s1571_s14 + $0x30] sm:$0xff] %vm732_vm2, %v690_v27 }
 0x3ae   : > { %755 = vst.msk [vmem:[%s1571_s14 + $0xb0] sm:$0xff] %vm732_vm2, %v722_v28 }
 0x3b0   : > { %v691_v29 = vpop.trf.xlu1 }
 0x3b1   : > { %v723_v30 = vpop.trf.xlu0  ;;  %740 = vst.msk [vmem:[%s1571_s14 + $0x38] sm:$0xff] %vm732_vm2, %v691_v29 }
 0x3b2   : > { %756 = vst.msk [vmem:[%s1571_s14 + $0xb8] sm:$0xff] %vm732_vm2, %v723_v30 }
 0x3b4   : > { %v692_v31 = vpop.trf.xlu1 }
 0x3b5   : > { %v724_v32 = vpop.trf.xlu0  ;;  %741 = vst.msk [vmem:[%s1571_s14 + $0x40] sm:$0xff] %vm732_vm2, %v692_v31 }
 0x3b6   : > { %757 = vst.msk [vmem:[%s1571_s14 + $0xc0] sm:$0xff] %vm732_vm2, %v724_v32 }
 0x3b8   : > { %v693_v33 = vpop.trf.xlu1 }
 0x3b9   : > { %v725_v34 = vpop.trf.xlu0  ;;  %742 = vst.msk [vmem:[%s1571_s14 + $0x48] sm:$0xff] %vm732_vm2, %v693_v33 }
 0x3ba   : > { %758 = vst.msk [vmem:[%s1571_s14 + $0xc8] sm:$0xff] %vm732_vm2, %v725_v34 }
 0x3bc   : > { %v694_v35 = vpop.trf.xlu1 }
 0x3bd   : > { %v726_v36 = vpop.trf.xlu0  ;;  %743 = vst.msk [vmem:[%s1571_s14 + $0x50] sm:$0xff] %vm732_vm2, %v694_v35 }
 0x3be   : > { %759 = vst.msk [vmem:[%s1571_s14 + $0xd0] sm:$0xff] %vm732_vm2, %v726_v36 }
 0x3c0   : > { %v695_v37 = vpop.trf.xlu1 }
 0x3c1   : > { %v727_v38 = vpop.trf.xlu0  ;;  %744 = vst.msk [vmem:[%s1571_s14 + $0x58] sm:$0xff] %vm732_vm2, %v695_v37 }
 0x3c2   : > { %760 = vst.msk [vmem:[%s1571_s14 + $0xd8] sm:$0xff] %vm732_vm2, %v727_v38 }
 0x3c4   : > { %v696_v39 = vpop.trf.xlu1 }
 0x3c5   : > { %v728_v40 = vpop.trf.xlu0  ;;  %745 = vst.msk [vmem:[%s1571_s14 + $0x60] sm:$0xff] %vm732_vm2, %v696_v39 }
 0x3c6   : > { %761 = vst.msk [vmem:[%s1571_s14 + $0xe0] sm:$0xff] %vm732_vm2, %v728_v40 }
 0x3c8   : > { %v697_v41 = vpop.trf.xlu1 }
 0x3c9   : > { %v729_v42 = vpop.trf.xlu0  ;;  %746 = vst.msk [vmem:[%s1571_s14 + $0x68] sm:$0xff] %vm732_vm2, %v697_v41 }
 0x3ca   : > { %762 = vst.msk [vmem:[%s1571_s14 + $0xe8] sm:$0xff] %vm732_vm2, %v729_v42 }
 0x3cc   : > { %v698_v43 = vpop.trf.xlu1  ;;  %771 = sbr.rel (!%p1450_p4) target bundleno = 1035 (0x40b), region = 52 }
 0x3cd   : > { %v730_v44 = vpop.trf.xlu0  ;;  %747 = vst.msk [vmem:[%s1571_s14 + $0x70] sm:$0xff] %vm732_vm2, %v698_v43 }
 0x3ce   : > { %763 = vst.msk [vmem:[%s1571_s14 + $0xf0] sm:$0xff] %vm732_vm2, %v730_v44 }
 0x3d0   : > { %v699_v45 = vpop.trf.xlu1 }
 0x3d1   : > { %v731_v46 = vpop.trf.xlu0  ;;  %748 = vst.msk [vmem:[%s1571_s14 + $0x78] sm:$0xff] %vm732_vm2, %v699_v45 }
 0x3d2   : > { %764 = vst.msk [vmem:[%s1571_s14 + $0xf8] sm:$0xff] %vm732_vm2, %v731_v46 }
 0x3d3   : > { %s1794_s24 = smov (!%p774_p8, %s773_s24), 32 }
 0x3d4   : > { %s1122_s19 = sshll.u32 %s1794_s24, 7 }
 0x3d5   : > { %p1125_p9 = scmp.eq.s32.totalorder %s1122_s19, 0 }
 0x3d6   : > { %s1650_s20 = sshrl.u32 (!%p1125_p9), %s1794_s24, 5 }
 0x3d7   : > { %782 = sbr.rel (%p1125_p9) target bundleno = 1035 (0x40b), region = 56  ;;  %p1126_p10 = scmp.le.s32.totalorder (!%p1125_p9), %s1650_s20, 0 }
 0x3de   : > { %1060 = sbr.rel (%p1126_p10) target bundleno = 1014 (0x3f6), region = 132  ;;  %s1785_s27 = smov (!%p1126_p10), %s1644_s18 }
 0x3df   : > { %s1786_s9 = smov (!%p1126_p10), %s1571_s14  ;;  %s1659_s10 = smov (!%p1126_p10), 0  }
 0x3e0   : > { %s1661_s21 = smov (!%p1126_p10), 0  }
 0x3e5 LB: >> { %v906_v47 = vld [vmem:[%s1358_s9] sm:$0xff]  ;;  %v908_v48 = vld [vmem:[%s1358_s9 + $0x8] sm:$0xff]  ;;  %v910_v49 = vld [vmem:[%s1358_s9 + $0x10] sm:$0xff]  ;;  %s970_s22 = sadd.s32 1, %s1362_s10  ;;  %s900_s21 = sadd.s32 1, %s1366_s21   ;;  %s1366_s21 = sphi %s1661_s21, %s900_s21   ;;  %s1362_s10 = sphi %s1659_s10, %s1789_s10   ;;  %s1358_s9 = sphi %s1786_s9, %s1788_s9   ;;  %s1354_s27 = sphi %s1785_s27, %s1787_s27  }
 0x3e6   : >> { %907 = vst [vmem:[%s1354_s27] sm:$0xff] %v906_v47  ;;  %909 = vst [vmem:[%s1354_s27 + $0x8] sm:$0xff] %v908_v48  ;;  %v912_v50 = vld [vmem:[%s1358_s9 + $0x18] sm:$0xff]  ;;  %v914_v51 = vld [vmem:[%s1358_s9 + $0x20] sm:$0xff]  ;;  %p971_p11 = scmp.ge.s32.totalorder %s970_s22, %s1650_s20  ;;  %p899_p12 = scmp.ge.s32.totalorder %s900_s21, %s1650_s20 }
 0x3e7   : >> { %911 = vst [vmem:[%s1354_s27 + $0x10] sm:$0xff] %v910_v49  ;;  %v916_v52 = vld [vmem:[%s1358_s9 + $0x28] sm:$0xff]  ;;  %913 = vst [vmem:[%s1354_s27 + $0x18] sm:$0xff] %v912_v50  ;;  %v918_v53 = vld [vmem:[%s1358_s9 + $0x30] sm:$0xff] }
 0x3e8   : >> { %915 = vst [vmem:[%s1354_s27 + $0x20] sm:$0xff] %v914_v51  ;;  %917 = vst [vmem:[%s1354_s27 + $0x28] sm:$0xff] %v916_v52  ;;  %v920_v2 = vld [vmem:[%s1358_s9 + $0x38] sm:$0xff]  ;;  %v922_v54 = vld [vmem:[%s1358_s9 + $0x40] sm:$0xff]  ;;  %s1796_s22 = smov (%p971_p11, %s970_s22), 0 }
 0x3e9   : >> { %919 = vst [vmem:[%s1354_s27 + $0x30] sm:$0xff] %v918_v53  ;;  %921 = vst [vmem:[%s1354_s27 + $0x38] sm:$0xff] %v920_v2  ;;  %v924_v55 = vld [vmem:[%s1358_s9 + $0x48] sm:$0xff]  ;;  %v926_v56 = vld [vmem:[%s1358_s9 + $0x50] sm:$0xff]  ;;  %s1127_s23 = sshll.u32 %s1796_s22, 8  ;;  %s1789_s10 = smov %s1796_s22 }
 0x3ea   : >> { %923 = vst [vmem:[%s1354_s27 + $0x40] sm:$0xff] %v922_v54  ;;  %v928_v57 = vld [vmem:[%s1358_s9 + $0x58] sm:$0xff]  ;;  %925 = vst [vmem:[%s1354_s27 + $0x48] sm:$0xff] %v924_v55  ;;  %v930_v58 = vld [vmem:[%s1358_s9 + $0x60] sm:$0xff]  ;;  %s1717_s26 = scalar_lea.vmem %s1571_s14, %s1127_s23 [#allocation2]   ;;  %s976_s29 = scalar_lea.vmem %s1644_s18, %s1127_s23  }
 0x3eb   : >> { %927 = vst [vmem:[%s1354_s27 + $0x50] sm:$0xff] %v926_v56  ;;  %929 = vst [vmem:[%s1354_s27 + $0x58] sm:$0xff] %v928_v57  ;;  %v932_v59 = vld [vmem:[%s1358_s9 + $0x68] sm:$0xff]  ;;  %v934_v60 = vld [vmem:[%s1358_s9 + $0x70] sm:$0xff] }
 0x3ec   : >> { %931 = vst [vmem:[%s1354_s27 + $0x60] sm:$0xff] %v930_v58  ;;  %933 = vst [vmem:[%s1354_s27 + $0x68] sm:$0xff] %v932_v59  ;;  %v936_v61 = vld [vmem:[%s1358_s9 + $0x78] sm:$0xff]  ;;  %v938_v62 = vld [vmem:[%s1358_s9 + $0x80] sm:$0xff] }
 0x3ed   : >> { %935 = vst [vmem:[%s1354_s27 + $0x70] sm:$0xff] %v934_v60  ;;  %v940_v63 = vld [vmem:[%s1358_s9 + $0x88] sm:$0xff]  ;;  %937 = vst [vmem:[%s1354_s27 + $0x78] sm:$0xff] %v936_v61  ;;  %v942_v1 = vld [vmem:[%s1358_s9 + $0x90] sm:$0xff] }
 0x3ee   : >> { %939 = vst [vmem:[%s1354_s27 + $0x80] sm:$0xff] %v938_v62  ;;  %941 = vst [vmem:[%s1354_s27 + $0x88] sm:$0xff] %v940_v63  ;;  %v944_v3 = vld [vmem:[%s1358_s9 + $0x98] sm:$0xff]  ;;  %v946_v4 = vld [vmem:[%s1358_s9 + $0xa0] sm:$0xff] }
 0x3ef   : >> { %943 = vst [vmem:[%s1354_s27 + $0x90] sm:$0xff] %v942_v1  ;;  %945 = vst [vmem:[%s1354_s27 + $0x98] sm:$0xff] %v944_v3  ;;  %v948_v5 = vld [vmem:[%s1358_s9 + $0xa8] sm:$0xff]  ;;  %v950_v6 = vld [vmem:[%s1358_s9 + $0xb0] sm:$0xff]  ;;  %902 = sbr.rel (!%p899_p12) target bundleno = 997 (0x3e5), region = 138 }
 0x3f0   : >> { %947 = vst [vmem:[%s1354_s27 + $0xa0] sm:$0xff] %v946_v4  ;;  %v952_v7 = vld [vmem:[%s1358_s9 + $0xb8] sm:$0xff]  ;;  %949 = vst [vmem:[%s1354_s27 + $0xa8] sm:$0xff] %v948_v5  ;;  %v954_v8 = vld [vmem:[%s1358_s9 + $0xc0] sm:$0xff] }
 0x3f1   : >> { %951 = vst [vmem:[%s1354_s27 + $0xb0] sm:$0xff] %v950_v6  ;;  %953 = vst [vmem:[%s1354_s27 + $0xb8] sm:$0xff] %v952_v7  ;;  %v956_v9 = vld [vmem:[%s1358_s9 + $0xc8] sm:$0xff]  ;;  %v958_v10 = vld [vmem:[%s1358_s9 + $0xd0] sm:$0xff] }
 0x3f2   : >> { %955 = vst [vmem:[%s1354_s27 + $0xc0] sm:$0xff] %v954_v8  ;;  %957 = vst [vmem:[%s1354_s27 + $0xc8] sm:$0xff] %v956_v9  ;;  %v960_v11 = vld [vmem:[%s1358_s9 + $0xd8] sm:$0xff]  ;;  %v962_v12 = vld [vmem:[%s1358_s9 + $0xe0] sm:$0xff] }
 0x3f3   : >> { %959 = vst [vmem:[%s1354_s27 + $0xd0] sm:$0xff] %v958_v10  ;;  %v964_v13 = vld [vmem:[%s1358_s9 + $0xe8] sm:$0xff]  ;;  %961 = vst [vmem:[%s1354_s27 + $0xd8] sm:$0xff] %v960_v11  ;;  %v966_v14 = vld [vmem:[%s1358_s9 + $0xf0] sm:$0xff] }
 0x3f4   : >> { %963 = vst [vmem:[%s1354_s27 + $0xe0] sm:$0xff] %v962_v12  ;;  %965 = vst [vmem:[%s1354_s27 + $0xe8] sm:$0xff] %v964_v13  ;;  %v968_v15 = vld [vmem:[%s1358_s9 + $0xf8] sm:$0xff]  ;;  %s1788_s9 = smov %s1717_s26 }
 0x3f5   : >> { %967 = vst [vmem:[%s1354_s27 + $0xf0] sm:$0xff] %v966_v14  ;;  %969 = vst [vmem:[%s1354_s27 + $0xf8] sm:$0xff] %v968_v15  ;;  %s1787_s27 = smov %s976_s29 }
 0x3f6 PF: > { %s1758_s30 = sand.u32 31, %s1794_s24   ;;  %s1138_s11 = sshll.u32 %s1650_s20, 8 }
 0x3f7   : > { %s981_s12 = scalar_lea.vmem %s1571_s14, %s1138_s11 [#allocation2]   ;;  %s983_s13 = scalar_lea.vmem %s1644_s18, %s1138_s11  }
 0x3f8   : > { %p1132_p13 = scmp.le.s32.totalorder %s1758_s30, 0 }
 0x3f9   : > { %s1368_s15 = smov (!%p1132_p13), %s983_s13   ;;  %s1372_s16 = smov (!%p1132_p13), %s981_s12  }
 0x3fa   : > { %1074 = sbr.rel (%p1132_p13) target bundleno = 1035 (0x40b), region = 143  ;;  %s1376_s17 = smov (!%p1132_p13), 0  }
 0x3fb   : > { %s1380_s19 = smov (!%p1132_p13), 0  }
 0x401 LB: >> { %v993_v16 = vld [vmem:[%s1374_s16] sm:$0xff]  ;;  %s995_s24 = sadd.s32 1, %s1378_s17  ;;  %s987_s19 = sadd.s32 1, %s1382_s19   ;;  %s1382_s19 = sphi %s1380_s19, %s987_s19   ;;  %s1378_s17 = sphi %s1376_s17, %s1377_s17   ;;  %s1374_s16 = sphi %s1372_s16, %s1000_s16   ;;  %s1370_s15 = sphi %s1368_s15, %s1001_s15  }
 0x402   : >> { %994 = vst [vmem:[%s1370_s15] sm:$0xff] %v993_v16  ;;  %p996_p0 = scmp.ge.s32.totalorder %s995_s24, %s1758_s30  ;;  %p986_p1 = scmp.ge.s32.totalorder %s987_s19, %s1758_s30 }
 0x404   : >> { %s1798_s24 = smov (%p996_p0, %s995_s24), 0  ;;  %989 = sbr.rel (!%p986_p1) target bundleno = 1025 (0x401), region = 149 }
 0x405   : >> { %s1133_s14 = sshll.u32 %s1798_s24, 3  ;;  %s1377_s17 = smov %s1798_s24  }
 0x406   : >> { %s1000_s16 = scalar_lea.vmem %s981_s12, %s1133_s14 [#allocation2]   ;;  %s1001_s15 = scalar_lea.vmem %s983_s13, %s1133_s14  }
 0x40b PF: > { %p14_p2 = scmp.ge.s32.totalorder %s1440_s28, 4   ;;  %s1790_s24 = smov %s1346_s25 }
 0x40c   : > { %s1791_s25 = smov %s1448_s8  ;;  %s1792_s26 = smov %s1440_s28 }
 0x40d   :  { %16 = sbr.rel (!%p14_p2) target bundleno = 2 (0x2), region = 160 }

</bundles_post_ra>
